<compile_context>
chip_gen: v5e
topology: v5e:2x2
jax: 0.10.0
libtpu: 0.0.40
codegen_flags: <defaults>
</compile_context>

<pallas_src>
import functools

import jax
import jax.numpy as jnp
from jax.experimental import pallas as pl
from jax.experimental.pallas import tpu as pltpu


def _round_up(x, m):
    return ((x + m - 1) // m) * m


@functools.lru_cache(maxsize=1)
def _num_tensorcores():
    """Best-effort TensorCores-per-chip (v7x has 2; v5e/v6e have 1)."""
    try:
        kind = jax.devices()[0].device_kind.lower()
    except Exception:
        return 1
    return 2 if ("v7" in kind or "7x" in kind) else 1


def _pick_row_tile(m_rows, desired):
    """Sublane-aligned row tile.

    Big tiles amortize per-grid-step overhead (~0.35us/step). Only on multi-TC chips
    (v7x) do we shrink the tile so the 'parallel' grid axis has an EVEN number of
    steps (balanced across both TensorCores); on 1-TC chips (v5e/v6e) extra steps are
    pure overhead, so keep the single largest tile.
    """
    m_pad = _round_up(max(m_rows, 8), 8)
    tm = min(_round_up(desired, 8), m_pad)
    if _num_tensorcores() >= 2 and m_pad > 8:
        steps = -(-m_pad // tm)  # cdiv
        if steps % 2 == 1:
            steps += 1
            tm = max(8, _round_up(-(-m_pad // steps), 8))
    return tm


# ----------------------------------------------------------------------------
# Lane-folded (permute + Linear) as one matmul.
# ----------------------------------------------------------------------------
def _folded_linear_kernel(x_ref, w_ref, b_ref, o_ref):
    # x_ref: (tm, F*T) compute_dtype, w_ref: (F*T, T*N) compute_dtype,
    # b_ref: (1, T*N) f32, o_ref: (tm, T*N) compute_dtype.
    acc = jnp.dot(x_ref[...], w_ref[...], preferred_element_type=jnp.float32)
    o_ref[...] = (acc + b_ref[...]).astype(o_ref.dtype)  # bias add on f32 accumulator


def pose_embedding_folded(x_folded, w_big, b_big, *, tm=1024):
    """x_folded: (M, F*T), w_big: (F*T, T*N), b_big: (1, T*N) f32 -> (M, T*N)."""
    M, K = x_folded.shape
    TN = w_big.shape[1]

    tm = _pick_row_tile(M, tm)
    # No host-side padding / slicing: cdiv grid; Pallas masks the ragged last block
    # (stores outside M are skipped; garbage padded input rows only feed those rows).
    grid_m = pl.cdiv(M, tm)

    return pl.pallas_call(
        _folded_linear_kernel,
        out_shape=jax.ShapeDtypeStruct((M, TN), x_folded.dtype),
        grid_spec=pltpu.PrefetchScalarGridSpec(
            num_scalar_prefetch=0,
            grid=(grid_m,),
            in_specs=[
                pl.BlockSpec((tm, K), lambda i: (i, 0)),
                pl.BlockSpec((K, TN), lambda i: (0, 0)),   # pinned folded weight
                pl.BlockSpec((1, TN), lambda i: (0, 0)),   # pinned folded bias (f32)
            ],
            out_specs=pl.BlockSpec((tm, TN), lambda i: (i, 0)),
        ),
        compiler_params=pltpu.CompilerParams(
            dimension_semantics=("parallel",)),
    )(x_folded, w_big, b_big)


# ----------------------------------------------------------------------------
# Module
# ----------------------------------------------------------------------------
class InputProcessPallas:
    """JAX/Pallas port of InputProcess.forward: x.permute(0,1,3,2) -> Linear(F, latent)."""

    # Below this many rows (M = B*J) the Pallas kernel is pure fixed overhead
    # (launch + 64x-inflated weight DMA); XLA is as fast or faster.
    _MIN_PALLAS_ROWS = 256
    # Cap on the folded F*T x T*N weight. Note (v5e): near this cap with bf16 the
    # folded matmul (T x the useful FLOPs) can flip MXU-bound there; lower if needed.
    _MAX_FOLDED_WEIGHT_BYTES = 2 * 1024 * 1024

    def __init__(self, data_rep, input_feats, latent_dim, key, *,
                 seq_len=None, compute_dtype=jnp.float32, row_tile=1024):
        self.data_rep = data_rep
        self.input_feats = input_feats
        self.latent_dim = latent_dim
        self.compute_dtype = jnp.dtype(compute_dtype)
        self.row_tile = row_tile

        kw, kb = jax.random.split(key)
        # Deterministic init mimicking nn.Linear default (uniform in +-1/sqrt(fan_in)).
        bound = 1.0 / (input_feats ** 0.5)
        # PyTorch Linear weight is (latent_dim, input_feats); store its transpose (f32 master).
        self.w_t = jax.random.uniform(
            kw, (input_feats, latent_dim), jnp.float32, -bound, bound)
        self.bias = jax.random.uniform(
            kb, (latent_dim,), jnp.float32, -bound, bound)

        # Folded-param cache keyed by T, built eagerly from CONCRETE weights (never
        # inside a jitted __call__).  If w_t/bias are ever mutated (training), call
        # invalidate_folded_cache().
        self._fold_cache = {}
        if seq_len is not None:
            self._folded_params(seq_len)

    def invalidate_folded_cache(self):
        self._fold_cache = {}

    def _folded_params(self, T):
        if T not in self._fold_cache:
            F, N = self.input_feats, self.latent_dim
            eye = jnp.eye(T, dtype=jnp.float32)
            # W_big[f*T + t', t*N + n] = w_t[f, n] * (t' == t)  (absorbs the permute)
            w_big = (self.w_t[:, None, None, :] * eye[None, :, :, None]
                     ).reshape(F * T, T * N)
            b_big = jnp.tile(self.bias, T).reshape(1, T * N)
            self._fold_cache[T] = (
                jax.device_put(w_big.astype(self.compute_dtype)),
                jax.device_put(b_big.astype(jnp.float32)),  # bias stays f32 (added to f32 acc)
            )
        return self._fold_cache[T]

    def _xla_forward(self, x):
        out = jnp.einsum("bjtf,fn->bjtn", jnp.swapaxes(x, 2, 3), self.w_t) + self.bias
        return out.astype(self.compute_dtype)

    def __call__(self, x, *, force_pallas=False):
        # x: (B, J, F, T); output (B, J, T, latent_dim)
        B, J, F, T = x.shape
        assert F == self.input_feats
        N = self.latent_dim
        M = B * J

        # Small-M dispatch: nothing to amortize kernel launch / inflated-weight DMA against.
        if not force_pallas and M < self._MIN_PALLAS_ROWS:
            return self._xla_forward(x)

        folded_weight_bytes = F * T * T * N * self.compute_dtype.itemsize
        if folded_weight_bytes <= self._MAX_FOLDED_WEIGHT_BYTES:
            w_big, b_big = self._folded_params(T)
            x_folded = x.reshape(M, F * T).astype(self.compute_dtype)  # free reshape, no transpose pass
            out = pose_embedding_folded(x_folded, w_big, b_big, tm=self.row_tile)
            return out.reshape(B, J, T, N)                              # free reshape

        # TODO(synk): very-large-T fallback (folded weight would be O(T^2)) uses XLA;
        # a lane-dense native-layout Pallas kernel could be added if this path matters.
        return self._xla_forward(x)


if __name__ == "__main__":
    key = jax.random.PRNGKey(0)
    k_x, k_p, k_x2 = jax.random.split(key, 3)

    # Reference shapes implied by the module: input_feats=16, frames(seq)=8, latent=32.
    B, J, F, T = 2, 4, 16, 8
    N = 32
    x_small = jax.random.normal(k_x, (B, J, F, T), dtype=jnp.float32)

    module = InputProcessPallas("rot6d", input_feats=F, latent_dim=N, key=k_p, seq_len=T)

    def ref_fn(x):
        return jnp.einsum("bjtf,fn->bjtn",
                          jnp.transpose(x, (0, 1, 3, 2)), module.w_t) + module.bias

    # 1) Default dispatch at the small reference shapes (XLA path, exact semantics).
    out_small = jax.block_until_ready(module(x_small))
    ref_small = ref_fn(x_small)
    assert out_small.shape == (B, J, T, N)
    assert jnp.allclose(out_small, ref_small, atol=1e-5, rtol=1e-5)

    # 2) The Pallas folded kernel itself, forced at the reference shapes.
    out_forced = jax.block_until_ready(module(x_small, force_pallas=True))
    assert out_forced.shape == (B, J, T, N)
    assert jnp.allclose(out_forced, ref_small, atol=1e-5, rtol=1e-5)

    # 3) Pallas folded kernel as the default path on a larger batch (M = 512 rows).
    B2, J2 = 4, 128
    x_large = jax.random.normal(k_x2, (B2, J2, F, T), dtype=jnp.float32)
    out_large = jax.block_until_ready(module(x_large))
    ref_large = ref_fn(x_large)
    assert out_large.shape == (B2, J2, T, N)
    assert jnp.allclose(out_large, ref_large, atol=1e-5, rtol=1e-5)

    # 4) bf16 I/O variant (same weights): f32 MXU accumulation, ~2x fewer HBM bytes.
    module_bf16 = InputProcessPallas("rot6d", input_feats=F, latent_dim=N, key=k_p,
                                     seq_len=T, compute_dtype=jnp.bfloat16)
    out_bf16 = jax.block_until_ready(module_bf16(x_large))
    assert out_bf16.dtype == jnp.bfloat16
    assert jnp.allclose(out_bf16.astype(jnp.float32), ref_large, atol=5e-2, rtol=5e-2)

    print("KERNEL_OK")
</pallas_src>

<mosaic_0001>
module attributes {stable_mosaic.version = 11 : i64} {
  func.func @_folded_linear_kernel(%arg0: i32, %arg1: memref<8x128xf32, #tpu.memory_space<vmem>>, %arg2: memref<128x256xf32, #tpu.memory_space<vmem>>, %arg3: memref<1x256xf32, #tpu.memory_space<vmem>>, %arg4: memref<8x256xf32, #tpu.memory_space<vmem>>) attributes {dimension_semantics = [#tpu.dimension_semantics<parallel>], iteration_bounds = array<i64: 1>, scalar_prefetch = 0 : i64, scratch_operands = 0 : i64, tpu.core_type = #tpu.core_type<tc>, window_params = [{transform_indices = @transform_0, window_bounds = array<i64: 8, 128>}, {pipeline_mode = #tpu.pipeline_mode<synchronous>, transform_indices = @transform_1, window_bounds = array<i64: 128, 256>}, {pipeline_mode = #tpu.pipeline_mode<synchronous>, transform_indices = @transform_2, window_bounds = array<i64: 1, 256>}, {transform_indices = @transform_3, window_bounds = array<i64: 8, 256>}]} {
    %c0 = arith.constant 0 : index
    %c0_0 = arith.constant 0 : index
    %0 = vector.load %arg1[%c0, %c0_0] : memref<8x128xf32, #tpu.memory_space<vmem>>, vector<8x128xf32>
    %c0_1 = arith.constant 0 : index
    %c0_2 = arith.constant 0 : index
    %1 = vector.load %arg2[%c0_1, %c0_2] : memref<128x256xf32, #tpu.memory_space<vmem>>, vector<128x256xf32>
    %cst = arith.constant dense<0.000000e+00> : vector<8x256xf32>
    %2 = tpu.matmul %0, %1, %cst {dimension_numbers = #tpu.dot_dimension_numbers<[1], [0], [0], [1], [0, 0, 1, 1], [], []>} : vector<8x128xf32>, vector<128x256xf32>, vector<8x256xf32> -> vector<8x256xf32>
    %c0_3 = arith.constant 0 : index
    %c0_4 = arith.constant 0 : index
    %3 = vector.load %arg3[%c0_3, %c0_4] : memref<1x256xf32, #tpu.memory_space<vmem>>, vector<1x256xf32>
    %4 = vector.broadcast %3 : vector<1x256xf32> to vector<8x256xf32>
    %5 = arith.addf %2, %4 : vector<8x256xf32>
    %c0_5 = arith.constant 0 : index
    %c0_6 = arith.constant 0 : index
    %6 = vector.load %arg4[%c0_5, %c0_6] : memref<8x256xf32, #tpu.memory_space<vmem>>, vector<8x256xf32>
    tpu.vector_store %arg4[%c0_5, %c0_6], %5 {strides = array<i32>} : memref<8x256xf32, #tpu.memory_space<vmem>>, vector<8x256xf32>,
    return
  }
  func.func @transform_0(%arg0: i32) -> (i32, i32) {
    %c0_i32 = arith.constant 0 : i32
    %c0_i32_0 = arith.constant 0 : i32
    return %arg0, %c0_i32 : i32, i32
  }
  func.func @transform_1(%arg0: i32) -> (i32, i32) {
    %c0_i32 = arith.constant 0 : i32
    %c0_i32_0 = arith.constant 0 : i32
    %c0_i32_1 = arith.constant 0 : i32
    return %c0_i32, %c0_i32_0 : i32, i32
  }
  func.func @transform_2(%arg0: i32) -> (i32, i32) {
    %c0_i32 = arith.constant 0 : i32
    %c0_i32_0 = arith.constant 0 : i32
    %c0_i32_1 = arith.constant 0 : i32
    return %c0_i32, %c0_i32_0 : i32, i32
  }
  func.func @transform_3(%arg0: i32) -> (i32, i32) {
    %c0_i32 = arith.constant 0 : i32
    %c0_i32_0 = arith.constant 0 : i32
    return %arg0, %c0_i32 : i32, i32
  }
}

</mosaic_0001>

<bundles_post_ra>
// kernel: tpu_custom_call.1
= control target key start
LH: loop header
LB: loop body
LE: loop exit
PB: predicated region body
PF: predicated region fallthrough
CT: control target
= control target key end

     0   :  { %8 = vsyncpa [#allocation3], 0  ;;  %s303_s0 = inlined_call_operand.hbm [shape: f32[8,128], index: 0, kind: input, shape index: {}]   ;;  %s304_s1 = inlined_call_operand.hbm [shape: f32[128,256], index: 1, kind: input, shape index: {}]   ;;  %s305_s2 = inlined_call_operand.hbm [shape: f32[1,256], index: 2, kind: input, shape index: {}]   ;;  %s306_s3 = inlined_call_operand.hbm [shape: f32[8,256], index: 3, kind: output, shape index: {}]  }
   0x1   :  { %9 = vsyncpa [#allocation6], 0  ;;  %s26_s14 = sshll.u32 %s304_s1, 4  ;;  %s27_s14 = int_to_ptr.hbm [resolvable:$true] %s26_s14 }
   0x2   :  { %10 = vsyncpa [#allocation4], 0  ;;  %s265_s15 = smov [#allocation5]   ;;  %s16_s19 = sshll.u32 %s303_s0, 4  ;;  %s17_s19 = int_to_ptr.hbm [resolvable:$true] %s16_s19 }
   0x3   :  { %s28_s16 = sshll.u32 %s265_s15, 4  ;;  %s266_s20 = smov 256   ;;  %s29_s16 = int_to_ptr.vmem [resolvable:$true] %s28_s16 }
   0x4   :  { %s267_s21 = smov 16   ;;  %s268_s22 = smov [#allocation2]  }
   0x5   :  { %34 = dma.hbm_to_vmem [thread:$0]  %s27_s14, 4096, %s29_s16, [#allocation6], %s266_s20, %s266_s20, %s267_s21  }
   0x6   :  { %s18_s23 = sshll.u32 %s268_s22, 4  ;;  %s40_s26 = sshll.u32 %s305_s2, 4  ;;  %s19_s23 = int_to_ptr.vmem [resolvable:$true] %s18_s23  ;;  %s41_s26 = int_to_ptr.hbm [resolvable:$true] %s40_s26 }
   0x7   :  { %21 = dma.hbm_to_vmem [thread:$0]  %s17_s19, 128, %s19_s23, [#allocation3]  }
   0x8   :  { %s269_s1 = smov [#allocation7]  }
   0x9   :  { %s42_s27 = sshll.u32 %s269_s1, 4  ;;  %s43_s27 = int_to_ptr.vmem [resolvable:$true] %s42_s27 }
   0xa   :  { %45 = dma.hbm_to_vmem [thread:$0]  %s41_s26, 32, %s43_s27, [#allocation6]  }
   0xb   :  { %259 = dma.done.wait [#allocation3], 128  }
   0xc   :  { %260 = vsyncadd [#allocation3], 4294967168 }
   0xd   :  { %261 = dma.done.wait [#allocation6], 4128  }
   0xe   :  { %262 = vsyncadd [#allocation6], 4294963168  ;;  %v89_v0 = vld [vmem:[#allocation5 + $0xf0] sm:$0xff]  ;;  %v90_v1 = vld [vmem:[#allocation5 + $0xf8] sm:$0xff]  ;;  %s270_s0 = smov [#allocation8]   ;;  %s146_s30 = sshll.u32 %s306_s3, 4  ;;  %s147_s30 = int_to_ptr.hbm [resolvable:$true] %s146_s30 }
   0xf   :  { %v87_v2 = vld [vmem:[#allocation5 + $0xe0] sm:$0xff]  ;;  %97 = vmatpush.msra.mxu0 %v89_v0  ;;  %117 = vmatpush.msra.mxu1 %v90_v1  ;;  %v88_v3 = vld [vmem:[#allocation5 + $0xe8] sm:$0xff]  ;;  %v85_v4 = vld [vmem:[#allocation5 + $0xd0] sm:$0xff]  ;;  %s144_s2 = sshll.u32 %s270_s0, 4  ;;  %s145_s2 = int_to_ptr.vmem [resolvable:$true] %s144_s2 }
  0x10   :  { %v86_v5 = vld [vmem:[#allocation5 + $0xd8] sm:$0xff]  ;;  %v83_v6 = vld [vmem:[#allocation5 + $0xc0] sm:$0xff]  ;;  %v84_v7 = vld [vmem:[#allocation5 + $0xc8] sm:$0xff] }
  0x11   :  { %98 = vmatpush.msra.mxu0 %v87_v2  ;;  %118 = vmatpush.msra.mxu1 %v88_v3  ;;  %v81_v8 = vld [vmem:[#allocation5 + $0xb0] sm:$0xff]  ;;  %v82_v9 = vld [vmem:[#allocation5 + $0xb8] sm:$0xff]  ;;  %v79_v10 = vld [vmem:[#allocation5 + $0xa0] sm:$0xff] }
  0x12   :  { %v80_v11 = vld [vmem:[#allocation5 + $0xa8] sm:$0xff]  ;;  %v77_v12 = vld [vmem:[#allocation5 + $0x90] sm:$0xff]  ;;  %v78_v13 = vld [vmem:[#allocation5 + $0x98] sm:$0xff] }
  0x13   :  { %99 = vmatpush.msra.mxu0 %v85_v4  ;;  %119 = vmatpush.msra.mxu1 %v86_v5  ;;  %v75_v14 = vld [vmem:[#allocation5 + $0x80] sm:$0xff]  ;;  %v76_v15 = vld [vmem:[#allocation5 + $0x88] sm:$0xff]  ;;  %v73_v16 = vld [vmem:[#allocation5 + $0x70] sm:$0xff] }
  0x14   :  { %v74_v17 = vld [vmem:[#allocation5 + $0x78] sm:$0xff]  ;;  %v71_v18 = vld [vmem:[#allocation5 + $0x60] sm:$0xff]  ;;  %v72_v19 = vld [vmem:[#allocation5 + $0x68] sm:$0xff] }
  0x15   :  { %100 = vmatpush.msra.mxu0 %v83_v6  ;;  %120 = vmatpush.msra.mxu1 %v84_v7  ;;  %v69_v20 = vld [vmem:[#allocation5 + $0x50] sm:$0xff]  ;;  %v70_v21 = vld [vmem:[#allocation5 + $0x58] sm:$0xff]  ;;  %v67_v22 = vld [vmem:[#allocation5 + $0x40] sm:$0xff] }
  0x16   :  { %v68_v23 = vld [vmem:[#allocation5 + $0x48] sm:$0xff]  ;;  %v65_v24 = vld [vmem:[#allocation5 + $0x30] sm:$0xff]  ;;  %v66_v25 = vld [vmem:[#allocation5 + $0x38] sm:$0xff] }
  0x17   :  { %101 = vmatpush.msra.mxu0 %v81_v8  ;;  %121 = vmatpush.msra.mxu1 %v82_v9  ;;  %v63_v26 = vld [vmem:[#allocation5 + $0x20] sm:$0xff]  ;;  %v64_v27 = vld [vmem:[#allocation5 + $0x28] sm:$0xff]  ;;  %v61_v28 = vld [vmem:[#allocation5 + $0x10] sm:$0xff] }
  0x18   :  { %v62_v29 = vld [vmem:[#allocation5 + $0x18] sm:$0xff]  ;;  %v59_v30 = vld [vmem:[#allocation5] sm:$0xff]  ;;  %v60_v31 = vld [vmem:[#allocation5 + $0x8] sm:$0xff] }
  0x19   :  { %102 = vmatpush.msra.mxu0 %v79_v10  ;;  %122 = vmatpush.msra.mxu1 %v80_v11  ;;  %v58_v32 = vld [vmem:[#allocation2] sm:$0xff]  ;;  %v91_v33 = vld [vmem:[#allocation7] sm:$0x3] }
  0x1a   :  { %v93_v34 = vperm.slane %v91_v33, 0  ;;  %v94_v35 = vperm.slane %v91_v33, 1 }
  0x1b   :  { %103 = vmatpush.msra.mxu0 %v77_v12  ;;  %123 = vmatpush.msra.mxu1 %v78_v13 }
  0x1d   :  { %104 = vmatpush.msra.mxu0 %v75_v14  ;;  %124 = vmatpush.msra.mxu1 %v76_v15 }
  0x1f   :  { %105 = vmatpush.msra.mxu0 %v73_v16  ;;  %125 = vmatpush.msra.mxu1 %v74_v17 }
  0x21   :  { %106 = vmatpush.msra.mxu0 %v71_v18  ;;  %126 = vmatpush.msra.mxu1 %v72_v19 }
  0x23   :  { %107 = vmatpush.msra.mxu0 %v69_v20  ;;  %127 = vmatpush.msra.mxu1 %v70_v21 }
  0x25   :  { %108 = vmatpush.msra.mxu0 %v67_v22  ;;  %128 = vmatpush.msra.mxu1 %v68_v23 }
  0x27   :  { %109 = vmatpush.msra.mxu0 %v65_v24  ;;  %129 = vmatpush.msra.mxu1 %v66_v25 }
  0x29   :  { %110 = vmatpush.msra.mxu0 %v63_v26  ;;  %130 = vmatpush.msra.mxu1 %v64_v27 }
  0x2b   :  { %111 = vmatpush.msra.mxu0 %v61_v28  ;;  %131 = vmatpush.msra.mxu1 %v62_v29 }
  0x2d   :  { %112 = vmatpush.msra.mxu0 %v59_v30  ;;  %132 = vmatpush.msra.mxu1 %v60_v31 }
  0x2e   :  { %113 = vmatmul.f32.vlgmr.msra.gmra.mxu0 %v58_v32  ;;  %133 = vmatmul.f32.vlgmr.msra.gmra.mxu1 %v58_v32 }
  0xab   :  { %v114_v36 = vpop.f32.mrf.mxu0  ;;  %v134_v37 = vpop.f32.mrf.mxu1 }
  0xac   :  { %v115_v38 = vadd.f32 %v114_v36, %v93_v34  ;;  %v135_v39 = vadd.f32 %v134_v37, %v94_v35 }
  0xae   :  { %137 = vst [vmem:[#allocation8] sm:$0xff] %v115_v38 }
  0xaf   :  { %138 = vst [vmem:[#allocation8 + $0x8] sm:$0xff] %v135_v39 }
  0xb0   :  { %149 = dma.vmem_to_hbm [thread:$0]  %s145_s2, 256, %s147_s30, [#allocation4]  }
  0xb1   :  { %263 = dma.done.wait [#allocation4], 256  }
  0xb2   :  { %264 = vsyncadd [#allocation4], 4294967040 }
  0xb3   :  { %154 = vsyncpa [#allocation3], 1 }
  0xb4   :  { %155 = vsyncpa [#allocation6], 1 }
  0xb5   :  { %156 = vsyncpa [#allocation4], 1 }

</bundles_post_ra>
